<compile_context>
chip_gen: v6e
topology: v6e:2x2x1
jax: 0.10.0
libtpu: 0.0.40
codegen_flags: <defaults>
</compile_context>

<pallas_src>
import functools

import jax
import jax.numpy as jnp
from jax.experimental import pallas as pl
from jax.experimental.pallas import tpu as pltpu


def _cdiv(a, b):
    return -(-a // b)


def _round_up(a, m):
    return _cdiv(a, m) * m


def _ce_kernel(logits_ref, labels_ref, out_ref, *, sub_lanes, needs_cast,
               mask_invalid):
    """One (image i, pixel-chunk ci, pixel-tile t) grid step.

    logits_ref: (1, C, hw_tile) float -- classes on sublanes, pixels on lanes
    labels_ref: (1, 1, hw_tile) signed int
    out_ref:    (1, 1, 1) float32     -- per-(image, chunk) NLL sum; resident
                                         across the innermost (t) axis
    """
    t = pl.program_id(2)

    @pl.when(t == 0)
    def _():
        out_ref[...] = jnp.zeros_like(out_ref)

    c = logits_ref.shape[1]
    num_sub = logits_ref.shape[2] // sub_lanes

    # Loop-invariant class-index iota, hoisted (JAX does not CSE broadcasts).
    class_ids = jax.lax.broadcasted_iota(jnp.int32, (c, sub_lanes), 0)

    def chunk_nll_sum(start):
        x = logits_ref[0, :, pl.ds(start, sub_lanes)]             # (C, sub)
        if needs_cast:
            x = x.astype(jnp.float32)
        lab = labels_ref[0, :, pl.ds(start, sub_lanes)]           # (1, sub)
        if lab.dtype != jnp.int32:
            lab = lab.astype(jnp.int32)

        # Numerically stable log-sum-exp over the class (sublane) axis.
        col_max = jnp.max(x, axis=0, keepdims=True)               # (1, sub)
        shifted = x - col_max                                     # (C, sub)
        # TODO(synk): if the single EUP ever binds on v7x, exp() could run in
        # bf16 (keep subtraction / accumulation in f32); unnecessary on
        # v5e/v6e where slower HBM keeps it hidden.
        lse = jnp.log(jnp.sum(jnp.exp(shifted), axis=0, keepdims=True))

        # Target logit in shifted space (the per-pixel max cancels in lse-tgt).
        tgt = jnp.sum(jnp.where(class_ids == lab, shifted, 0.0),
                      axis=0, keepdims=True)                      # (1, sub)
        nll = lse - tgt
        if mask_invalid:
            # Wrapper-side padding uses sentinel label -1 -> contributes 0.
            nll = jnp.where(lab >= 0, nll, 0.0)
        return jnp.sum(nll, axis=1, keepdims=True)                # (1, 1)

    if num_sub == 1:
        total = chunk_nll_sum(0)
    else:
        def body(j, carry):
            start = pl.multiple_of(j * sub_lanes, sub_lanes)
            return carry + chunk_nll_sum(start)

        total = jax.lax.fori_loop(0, num_sub, body,
                                  jnp.zeros((1, 1), jnp.float32))

    out_ref[...] += total.reshape(1, 1, 1)


def _device_params():
    """Per-generation (target logits-block bytes, scoped VMEM limit bytes)."""
    kind = ""
    try:
        kind = jax.devices()[0].device_kind.lower()
    except Exception:  # defensive: fall back to conservative defaults
        pass
    if "v7" in kind or "7x" in kind:
        # 64 MiB physical VMEM per TensorCore, 3.2 TB/s HBM: bigger tiles, but
        # leave headroom for pipeline buffers + compiler internal scratch.
        return 8 << 20, 48 << 20
    if "v6" in kind:
        return 6 << 20, 64 << 20          # 128 MiB physical VMEM
    if "v5" in kind:
        return 4 << 20, 64 << 20          # slow HBM already amortizes overhead
    return 4 << 20, 32 << 20              # unknown generation: stay conservative


def _sublane_padded_bytes(rows, itemsize):
    """Per-lane VMEM bytes for `rows` sublanes, honoring (32/itemsize, 128)
    tiled-layout sublane padding (a 1-row int32 block still costs 8 rows)."""
    sublane_tile = max(1, 32 // itemsize)
    return _round_up(rows, sublane_tile) * itemsize


def _plan_tiling(hw, c, in_itemsize, lab_itemsize, target_block_bytes,
                 vmem_limit):
    """Choose (hw_tile, num_tiles, hw_padded) for the pixel (lane) axis."""
    buffers = 3                                       # pl.Buffered(3) inputs
    per_lane = buffers * (_sublane_padded_bytes(c, in_itemsize)
                          + _sublane_padded_bytes(1, lab_itemsize))
    headroom = 4 << 20                                # body temporaries etc.
    budget_lanes = max(128, (vmem_limit - headroom) // per_lane)
    target_lanes = max(128, target_block_bytes // max(1, c * in_itemsize))
    max_lanes = max(128, (min(budget_lanes, target_lanes) // 128) * 128)

    if hw <= max_lanes:
        num_tiles = 1
        hw_tile = _round_up(hw, 128)
    else:
        num_tiles = _cdiv(hw, max_lanes)
        hw_tile = _round_up(_cdiv(hw, num_tiles), 128)
        if hw_tile >= 32768:
            # Quantize large tiles to 2048 lanes so the in-body sub-chunk loop
            # runs on full (C, 2048) slabs instead of 128-lane slivers
            # (padding overhead <= ~6%).
            hw_tile = _round_up(hw_tile, 2048)
    return hw_tile, num_tiles, hw_tile * num_tiles


def _pick_sub_lanes(hw_tile):
    for s in (2048, 1024, 512, 256, 128):
        if hw_tile % s == 0:
            return s
    return hw_tile


def cross_entropy(pred, labels):
    """pred: (N, C, H, W) float logits; labels: (N, H, W) integer class ids.
    Returns the scalar mean cross-entropy (f32), matching
    torch.nn.CrossEntropyLoss() with default arguments."""
    n, c, h, w = pred.shape
    hw = h * w

    # TODO(synk): ignore_index (torch default -100) and per-class weights are
    # not supported; labels are assumed to be valid class indices in [0, C).

    # Consume labels in their native signed integer width (int8/int16/int32)
    # to save HBM traffic; anything else is cast to int32 once in the wrapper.
    if (jnp.issubdtype(labels.dtype, jnp.signedinteger)
            and jnp.dtype(labels.dtype).itemsize <= 4):
        labels_k = labels
    else:
        labels_k = labels.astype(jnp.int32)

    in_itemsize = jnp.dtype(pred.dtype).itemsize
    lab_itemsize = jnp.dtype(labels_k.dtype).itemsize
    target_block_bytes, vmem_limit = _device_params()
    hw_tile, num_tiles, hw_padded = _plan_tiling(
        hw, c, in_itemsize, lab_itemsize, target_block_bytes, vmem_limit)
    sub_lanes = _pick_sub_lanes(hw_tile)

    logits = pred.reshape(n, c, hw)                    # free contiguous reshape
    labels3d = labels_k.reshape(n, 1, hw)
    pad = hw_padded - hw
    if pad:
        # Pad the pixel axis to a whole number of lane tiles; padded lanes get
        # sentinel label -1 and are masked out in-kernel.
        logits = jnp.pad(logits, ((0, 0), (0, 0), (0, pad)))
        labels3d = jnp.pad(labels3d, ((0, 0), (0, 0), (0, pad)),
                           constant_values=-1)

    # Split the pixel-tile axis into a parallel chunk axis so both v7x
    # TensorCores have work even when N is small (harmless on 1-TC chips).
    n_chunks = 2 if (num_tiles % 2 == 0 and num_tiles >= 2) else 1
    tiles_per_chunk = num_tiles // n_chunks
    grid = (n, n_chunks, tiles_per_chunk)
    total_steps = n * n_chunks * tiles_per_chunk

    def in_spec(block_shape):
        imap = lambda i, ci, t: (i, 0, ci * tiles_per_chunk + t)
        if total_steps >= 3:
            # Memory-bound kernel: 3-deep buffering keeps HBM reads
            # back-to-back across the short per-tile compute.
            return pl.BlockSpec(block_shape, imap, pipeline_mode=pl.Buffered(3))
        return pl.BlockSpec(block_shape, imap)

    kernel = functools.partial(
        _ce_kernel,
        sub_lanes=sub_lanes,
        needs_cast=(jnp.dtype(pred.dtype) != jnp.dtype(jnp.float32)),
        mask_invalid=(pad > 0),
    )

    partials = pl.pallas_call(
        kernel,
        out_shape=jax.ShapeDtypeStruct((n * n_chunks, 1, 1), jnp.float32),
        grid_spec=pltpu.PrefetchScalarGridSpec(
            num_scalar_prefetch=0,
            grid=grid,
            in_specs=[
                in_spec((1, c, hw_tile)),
                in_spec((1, 1, hw_tile)),
            ],
            out_specs=pl.BlockSpec(
                (1, 1, 1), lambda i, ci, t: (i * n_chunks + ci, 0, 0)),
        ),
        compiler_params=pltpu.CompilerParams(
            dimension_semantics=("parallel", "parallel", "arbitrary"),
            vmem_limit_bytes=vmem_limit,
        ),
    )(logits, labels3d)

    # Mean over all N*H*W pixels (torch 'mean' reduction); padded lanes were
    # masked to 0 so the true pixel count is the right denominator.
    return jnp.sum(partials) / jnp.float32(n * hw)


if __name__ == "__main__":
    key = jax.random.PRNGKey(0)
    k1, k2 = jax.random.split(key)

    N, C, H, W = 2, 4, 16, 16
    pred = jax.random.normal(k1, (N, C, H, W), dtype=jnp.float32)
    labels = jax.random.randint(k2, (N, H, W), 0, C, dtype=jnp.int32)

    loss = cross_entropy(pred, labels)
    loss = jax.block_until_ready(loss)

    # Pure-JAX reference (same semantics as torch.nn.CrossEntropyLoss, mean).
    logits_ref = jnp.transpose(pred, (0, 2, 3, 1)).reshape(-1, C)
    lab = labels.reshape(-1)
    lse_ref = jax.scipy.special.logsumexp(logits_ref, axis=1)
    ref = jnp.mean(lse_ref - logits_ref[jnp.arange(logits_ref.shape[0]), lab])
    assert jnp.allclose(loss, ref, atol=1e-5, rtol=1e-5), (loss, ref)

    print("KERNEL_OK")
</pallas_src>

<mosaic_0001>
module attributes {stable_mosaic.version = 11 : i64} {
  func.func @_ce_kernel(%arg0: i32, %arg1: i32, %arg2: i32, %arg3: memref<1x4x256xf32, #tpu.memory_space<vmem>>, %arg4: memref<1x1x256xi32, #tpu.memory_space<vmem>>, %arg5: memref<1x1x1xf32, #tpu.memory_space<vmem>>) attributes {dimension_semantics = [#tpu.dimension_semantics<parallel>, #tpu.dimension_semantics<parallel>, #tpu.dimension_semantics<arbitrary>], iteration_bounds = array<i64: 2, 1, 1>, scalar_prefetch = 0 : i64, scratch_operands = 0 : i64, tpu.core_type = #tpu.core_type<tc>, window_params = [{transform_indices = @transform_0, window_bounds = array<i64: 1, 4, 256>}, {transform_indices = @transform_1, window_bounds = array<i64: 1, 1, 256>}, {transform_indices = @transform_2, window_bounds = array<i64: 1, 1, 1>}]} {
    %c0_i32 = arith.constant 0 : i32
    %0 = arith.cmpi eq, %arg2, %c0_i32 : i32
    %1 = arith.extui %0 : i1 to i32
    %c0_i32_0 = arith.constant 0 : i32
    %2 = arith.cmpi ne, %1, %c0_i32_0 : i32
    scf.if %2 {
      %cst_16 = arith.constant 0.000000e+00 : f32
      %29 = vector.broadcast %cst_16 : f32 to vector<1x1x1xf32>
      %c0_17 = arith.constant 0 : index
      %c0_18 = arith.constant 0 : index
      %c0_19 = arith.constant 0 : index
      %30 = vector.load %arg5[%c0_17, %c0_18, %c0_19] : memref<1x1x1xf32, #tpu.memory_space<vmem>>, vector<1x1x1xf32>
      tpu.vector_store %arg5[%c0_17, %c0_18, %c0_19], %29 {strides = array<i32>} : memref<1x1x1xf32, #tpu.memory_space<vmem>>, vector<1x1x1xf32>,
    } else {
    }
    %3 = tpu.iota {dimensions = array<i32: 0>} : vector<4x256xi32>
    %c0 = arith.constant 0 : index
    %c0_1 = arith.constant 0 : index
    %c0_2 = arith.constant 0 : index
    %4 = vector.load %arg3[%c0, %c0_1, %c0_2] : memref<1x4x256xf32, #tpu.memory_space<vmem>>, vector<1x4x256xf32>
    %5 = vector.shape_cast %4 : vector<1x4x256xf32> to vector<4x256xf32>
    %c0_3 = arith.constant 0 : index
    %c0_4 = arith.constant 0 : index
    %c0_5 = arith.constant 0 : index
    %6 = vector.load %arg4[%c0_3, %c0_4, %c0_5] : memref<1x1x256xi32, #tpu.memory_space<vmem>>, vector<1x1x256xi32>
    %7 = vector.shape_cast %6 : vector<1x1x256xi32> to vector<1x256xi32>
    %cst = arith.constant dense<0xFF800000> : vector<256xf32>
    %8 = vector.multi_reduction <maximumf>, %5, %cst [0] : vector<4x256xf32> to vector<256xf32>
    %9 = vector.shape_cast %8 : vector<256xf32> to vector<1x256xf32>
    %10 = vector.broadcast %9 : vector<1x256xf32> to vector<4x256xf32>
    %11 = arith.subf %5, %10 : vector<4x256xf32>
    %12 = math.exp %11 : vector<4x256xf32>
    %cst_6 = arith.constant dense<0.000000e+00> : vector<256xf32>
    %13 = vector.multi_reduction <add>, %12, %cst_6 [0] : vector<4x256xf32> to vector<256xf32>
    %14 = vector.shape_cast %13 : vector<256xf32> to vector<1x256xf32>
    %15 = math.log %14 : vector<1x256xf32>
    %16 = vector.broadcast %7 : vector<1x256xi32> to vector<4x256xi32>
    %17 = arith.cmpi eq, %3, %16 : vector<4x256xi32>
    %cst_7 = arith.constant 0.000000e+00 : f32
    %18 = vector.broadcast %cst_7 : f32 to vector<4x256xf32>
    %19 = arith.select %17, %11, %18 : vector<4x256xi1>, vector<4x256xf32>
    %cst_8 = arith.constant dense<0.000000e+00> : vector<256xf32>
    %20 = vector.multi_reduction <add>, %19, %cst_8 [0] : vector<4x256xf32> to vector<256xf32>
    %21 = vector.shape_cast %20 : vector<256xf32> to vector<1x256xf32>
    %22 = arith.subf %15, %21 : vector<1x256xf32>
    %cst_9 = arith.constant dense<0.000000e+00> : vector<1xf32>
    %23 = vector.multi_reduction <add>, %22, %cst_9 [1] : vector<1x256xf32> to vector<1xf32>
    %24 = vector.shape_cast %23 : vector<1xf32> to vector<1x1xf32>
    %c0_10 = arith.constant 0 : index
    %c0_11 = arith.constant 0 : index
    %c0_12 = arith.constant 0 : index
    %25 = vector.load %arg5[%c0_10, %c0_11, %c0_12] : memref<1x1x1xf32, #tpu.memory_space<vmem>>, vector<1x1x1xf32>
    %26 = vector.shape_cast %24 : vector<1x1xf32> to vector<1x1x1xf32>
    %27 = arith.addf %25, %26 : vector<1x1x1xf32>
    %c0_13 = arith.constant 0 : index
    %c0_14 = arith.constant 0 : index
    %c0_15 = arith.constant 0 : index
    %28 = vector.load %arg5[%c0_13, %c0_14, %c0_15] : memref<1x1x1xf32, #tpu.memory_space<vmem>>, vector<1x1x1xf32>
    tpu.vector_store %arg5[%c0_13, %c0_14, %c0_15], %27 {strides = array<i32>} : memref<1x1x1xf32, #tpu.memory_space<vmem>>, vector<1x1x1xf32>,
    return
  }
  func.func @transform_0(%arg0: i32, %arg1: i32, %arg2: i32) -> (i32, i32, i32) {
    %c1_i32 = arith.constant 1 : i32
    %0 = arith.muli %arg1, %c1_i32 : i32
    %1 = arith.addi %0, %arg2 : i32
    %c0_i32 = arith.constant 0 : i32
    %c0_i32_0 = arith.constant 0 : i32
    return %arg0, %c0_i32, %1 : i32, i32, i32
  }
  func.func @transform_1(%arg0: i32, %arg1: i32, %arg2: i32) -> (i32, i32, i32) {
    %c1_i32 = arith.constant 1 : i32
    %0 = arith.muli %arg1, %c1_i32 : i32
    %1 = arith.addi %0, %arg2 : i32
    %c0_i32 = arith.constant 0 : i32
    %c0_i32_0 = arith.constant 0 : i32
    return %arg0, %c0_i32, %1 : i32, i32, i32
  }
  func.func @transform_2(%arg0: i32, %arg1: i32, %arg2: i32) -> (i32, i32, i32) {
    %c1_i32 = arith.constant 1 : i32
    %0 = arith.muli %arg0, %c1_i32 : i32
    %1 = arith.addi %0, %arg1 : i32
    %c0_i32 = arith.constant 0 : i32
    %c0_i32_0 = arith.constant 0 : i32
    %c0_i32_1 = arith.constant 0 : i32
    return %1, %c0_i32, %c0_i32_0 : i32, i32, i32
  }
}

</mosaic_0001>

<bundles_post_ra>
// kernel: tpu_custom_call.1
= control target key start
LH: loop header
LB: loop body
LE: loop exit
PB: predicated region body
PF: predicated region fallthrough
CT: control target
= control target key end

     0   :  { %7 = vsyncpa [#allocation3], 0  ;;  %s795_s0 = inlined_call_operand.hbm [shape: f32[2,4,256], index: 0, kind: input, shape index: {}]   ;;  %s796_s1 = inlined_call_operand.hbm [shape: s32[2,1,256], index: 1, kind: input, shape index: {}]   ;;  %s797_s2 = inlined_call_operand.vmem [shape: f32[2,1,1], index: 2, kind: output, shape index: {}]  }
   0x1   :  { %9 = vsyncpa [#allocation3 + $0x1], 0 }
   0x2   :  { %10 = vsyncpa [#allocation5], 0 }
   0x3   :  { %12 = vsyncpa [#allocation5 + $0x1], 0  ;;  %s651_s9 = smov 0   ;;  %s653_s10 = smov 0  }
   0x4   :  { %s655_s11 = smov 0   ;;  %s657_s12 = smov 0  }
   0x5   :  { %s659_s13 = smov 0   ;;  %s661_s14 = smov 0  }
   0x6 LB: > { %s436_s15 = sadd.s32 4294967295, %s631_s14   ;;  %s37_s16 = sadd.s32 1, %s627_s13  ;;  %s631_s14 = sphi %s661_s14, %s18_s14   ;;  %s627_s13 = sphi %s659_s13, %s806_s13   ;;  %s623_s12 = sphi %s657_s12, %s805_s12   ;;  %s619_s11 = sphi %s655_s11, %s804_s11   ;;  %s615_s10 = sphi %s653_s10, %s803_s10   ;;  %s611_s9 = sphi %s651_s9, %s802_s9  }
   0x7   : > { %p39_p0 = scmp.ge.s32.totalorder %s37_s16, 2  ;;  %s48_s17 = sadd.s32 1, %s619_s11 }
   0x8   : > { %p55_p1 = scmp.ne.s32.totalorder %s619_s11, %s615_s10  ;;  %p56_p2 = scmp.eq.s32.totalorder %s631_s14, 0 }
   0x9   : > { %s808_s16 = smov (%p39_p0, %s37_s16), 0  ;;  %p61_p4 = scmp.ne.s32.totalorder %s615_s10, %s611_s9 }
   0xa   : > { %p687_p3 = por %p56_p2, %p55_p1  ;;  %s43_s19 = ssub.s32 %s627_s13, %s808_s16 }
   0xb   : > { %p62_p5 = scmp.eq.s32.totalorder %s436_s15, 0  ;;  %p46_p6 = scmp.eq.s32.totalorder %s43_s19, 0 }
   0xc   : > { %p464_p8 = scmp.lt.s32.totalorder %s631_s14, 2  ;;  %s703_s22 = sand.u32 1, %s619_s11  }
   0xd   : > { %p694_p7 = por %p62_p5, %p61_p4  ;;  %s451_s23 = sshll.u32 %s627_s13, 7 }
   0xe   : > { %s700_s21 = scalar_select %p46_p6, %s619_s11, %s48_s17  }
   0xf   : > { %s440_s24 = sshll.u32 %s703_s22, 3  ;;  %s156_s27 = scalar_lea.hbm %s795_s0, %s451_s23 }
  0x10   : > { %s147_s28 = scalar_lea.vmem [#allocation2], %s440_s24  ;;  %p712_p9 = pnand %p464_p8, %p687_p3 }
  0x11   : > { %s158_s29 = sshll.u32 %s147_s28, 4  ;;  %p446_p10 = scmp.ge.s32.totalorder %s631_s14, 1  ;;  %s159_s29 = int_to_ptr.vmem [resolvable:$true] %s158_s29 }
  0x12   : > { %p185_p11 = scmp.lt.s32.totalorder %s631_s14, 3  ;;  %s144_s3 = scalar_lea.sflag [#allocation3], %s703_s22 }
  0x13   : > { %p523_p12 = pneg %p712_p9  ;;  %s534_s4 = scalar_lea.vmem %s159_s29, 128 }
  0x14   : > { %p535_p13 = scmp.ne.s32.totalorder %s159_s29, %s534_s4  ;;  %s633_s5 = smov [#allocation2]  }
  0x15   : > { %s539_s6 = sshll.u32 %s633_s5, 4  ;;  %s540_s6 = int_to_ptr.vmem [resolvable:$false] %s539_s6 }
  0x16   : > { %p537_p0 = pnand %p535_p13, %p523_p12  ;;  %s541_s7 = scalar_lea.vmem %s540_s6, 256 }
  0x17   : > { %p542_p2 = scmp.lt.s32.totalorder %s159_s29, %s540_s6  ;;  %p543_p3 = scmp.lt.s32.totalorder %s541_s7, %s534_s4 }
  0x18   : > { %p538_p1 = pneg %p537_p0 }
  0x19   : > { %p544_p4 = por %p543_p3, %p542_p2 }
  0x1b   : > { %p545_p5 = pnand %p544_p4, %p538_p1 }
  0x1d   : > { %548 = shalt.err (!%p545_p5)
}
  0x1e   : > { %460 = dma.hbm_to_vmem [thread:$0]  (!%p712_p9), %s156_s27, 128, %s159_s29, %s144_s3  }
  0x1f   : > { %p730_p6 = pnand %p446_p10, %p185_p11  ;;  %s443_s9 = sshll.u32 %s703_s22, 1 }
  0x20   : > { %s452_s15 = sshll.u32 %s627_s13, 5  ;;  %s169_s23 = scalar_lea.vmem [#allocation4], %s443_s9 }
  0x21   : > { %s178_s19 = scalar_lea.hbm %s796_s1, %s452_s15  ;;  %s180_s24 = sshll.u32 %s169_s23, 4  ;;  %s181_s24 = int_to_ptr.vmem [resolvable:$true] %s180_s24 }
  0x22   : > { %s166_s25 = scalar_lea.sflag [#allocation5], %s703_s22  ;;  %s562_s26 = scalar_lea.vmem %s181_s24, 32 }
  0x23   : > { %p563_p8 = scmp.ne.s32.totalorder %s181_s24, %s562_s26  ;;  %s634_s27 = smov [#allocation4]  }
  0x24   : > { %s567_s28 = sshll.u32 %s634_s27, 4  ;;  %s568_s28 = int_to_ptr.vmem [resolvable:$false] %s567_s28 }
  0x25   : > { %p565_p13 = pnand %p563_p8, %p523_p12  ;;  %s569_s29 = scalar_lea.vmem %s568_s28, 64 }
  0x26   : > { %p570_p10 = scmp.lt.s32.totalorder %s181_s24, %s568_s28  ;;  %p571_p11 = scmp.lt.s32.totalorder %s569_s29, %s562_s26 }
  0x27   : > { %p566_p0 = pneg %p565_p13 }
  0x28   : > { %p572_p1 = por %p571_p11, %p570_p10 }
  0x2a   : > { %p573_p2 = pnand %p572_p1, %p566_p0 }
  0x2c   : > { %576 = shalt.err (!%p573_p2)
}
  0x2d   : > { %463 = dma.hbm_to_vmem [thread:$0]  (!%p712_p9), %s178_s19, 32, %s181_s24, %s166_s25  }
  0x2e   : > { %189 = sbr.rel (%p730_p6) target bundleno = 267 (0x10b), region = 28  ;;  %s191_s22 = sand.u32 (!%p730_p6), 1, %s615_s10  }
  0x2f   : > { %s447_s3 = sshll.u32 (!%p730_p6), %s191_s22, 3  ;;  %s192_s4 = scalar_lea.sflag (!%p730_p6), [#allocation3], %s191_s22 }
  0x30   : > { %s195_s5 = scalar_lea.vmem (!%p730_p6), [#allocation2], %s447_s3 }
  0x33   : > { %602 = dma.done.wait (%p694_p7), %s192_s4, 128  }
  0x34   : > { %604 = vsyncadd (%p694_p7), %s192_s4, 4294967168  ;;  %s448_s6 = sshll.u32 %s191_s22, 1  ;;  %s201_s7 = scalar_lea.sflag [#allocation5], %s191_s22 }
  0x35   : > { %s752_s9 = scalar_lea.vmem [#allocation4], %s448_s6 }
  0x36   : > { %606 = dma.done.wait (%p694_p7), %s201_s7, 32  }
  0x37   : > { %608 = vsyncadd (%p694_p7), %s201_s7, 4294967264  ;;  %p234_p9 = scmp.lt.s32.totalorder %s623_s12, 1  ;;  %vm242_vm0 = vcmask 0   ;;  %vm251_vm1 = vcmask 1043456   ;;  %v635_v0 = vmov 0.0   ;;  %v246_v1 = vld [vmem:[%s195_s5] sm:$0xff]  ;;  %v244_v17 = vlaneseq }
  0x38   : > { %v249_v2 = vcombine.high %v246_v1, %v246_v1  ;;  %v252_v3 = vsel %vm251_vm1, %v246_v1, -inf  ;;  %v247_v23 = vld [vmem:[%s752_s9] sm:$0x3] }
  0x39   : > { %s810_s12 = smov (!%p234_p9, %s623_s12), 1  ;;  %v253_v4 = vrot.slane %v252_v3, 4  ;;  %v245_v20 = vshrl.u32 %v244_v17, 7 }
  0x3a   : > { %s763_s15 = scalar_lea.vmem %s797_s2, %s810_s12  ;;  %v259_v5 = vsel %vm251_vm1, %v249_v2, -inf }
  0x3b   : > { %243 = vst.msk [vmem:[%s763_s15] sm:$0x1] %vm242_vm0, %v635_v0  ;;  %v254_v6 = vmax.f32 %v252_v3, %v253_v4  ;;  %v260_v7 = vrot.slane %v259_v5, 4  ;;  %v296_v22 = vsub.s32 0, %v245_v20  ;;  %v300_v24 = vsub.s32 1, %v245_v20 }
  0x3d   : > { %v255_v8 = vrot.slane %v254_v6, 2  ;;  %v261_v9 = vmax.f32 %v259_v5, %v260_v7  ;;  %v297_v25 = vrot.slane %v247_v23, %v296_v22  ;;  %v301_v26 = vrot.slane %v247_v23, %v300_v24 }
  0x3f   : > { %v256_v10 = vmax.f32 %v254_v6, %v255_v8  ;;  %v262_v11 = vrot.slane %v261_v9, 2  ;;  %vm302_vm2 = vcmp.eq.s32.totalorder %v245_v20, %v297_v25  ;;  %vm303_vm3 = vcmp.eq.s32.totalorder %v245_v20, %v301_v26 }
  0x41   : > { %v257_v12 = vrot.slane %v256_v10, 1  ;;  %v263_v13 = vmax.f32 %v261_v9, %v262_v11 }
  0x42   : > { %v328_v3 = vld [vmem:[%s763_s15] sm:$0x1] }
  0x43   : > { %v258_v14 = vmax.f32 %v256_v10, %v257_v12  ;;  %v264_v15 = vrot.slane %v263_v13, 1 }
  0x45   : > { %v265_v16 = vmax.f32 %v263_v13, %v264_v15 }
  0x47   : > { %v268_v18 = vcombine.low %v258_v14, %v265_v16 }
  0x49   : > { %v270_v19 = vsub.f32 %v246_v1, %v268_v18 }
  0x4b   : > { %v271_v21 = vmul.f32 1.442695, %v270_v19  ;;  %v305_v27 = vcombine.high %v270_v19, %v270_v19  ;;  %v307_v29 = vsel %vm302_vm2, %v270_v19, 0.0 }
  0x4c   : > { %v309_v35 = vsel %vm251_vm1, %v307_v29, 0.0 }
  0x4d   : > { %515 = vpow2.f32 %v271_v21  ;;  %v308_v33 = vsel %vm303_vm3, %v305_v27, 0.0  ;;  %v310_v41 = vrot.slane %v309_v35, 4 }
  0x4e   : > { %v316_v38 = vsel %vm251_vm1, %v308_v33, 0.0 }
  0x4f   : > { %v317_v44 = vrot.slane %v316_v38, 4  ;;  %v311_v47 = vadd.f32 %v310_v41, %v309_v35 }
  0x51   : > { %v318_v50 = vadd.f32 %v317_v44, %v316_v38  ;;  %v312_v52 = vrot.slane %v311_v47, 2 }
  0x53   : > { %v319_v53 = vrot.slane %v318_v50, 2  ;;  %v313_v54 = vadd.f32 %v312_v52, %v311_v47 }
  0x55   : > { %v320_v55 = vadd.f32 %v319_v53, %v318_v50  ;;  %v314_v56 = vrot.slane %v313_v54, 1 }
  0x57   : > { %v321_v57 = vrot.slane %v320_v55, 1  ;;  %v315_v58 = vadd.f32 %v314_v56, %v313_v54 }
  0x59   : > { %v322_v61 = vadd.f32 %v321_v57, %v320_v55 }
  0x5a   : > { %v516_v28 = vpop.eup %515 }
  0x5b   : > { %v274_v30 = vcombine.high %v516_v28, %v516_v28  ;;  %v276_v31 = vsel %vm251_vm1, %v516_v28, 0.0 }
  0x5c   : > { %v277_v32 = vrot.slane %v276_v31, 4 }
  0x5d   : > { %v283_v34 = vsel %vm251_vm1, %v274_v30, 0.0 }
  0x5e   : > { %v278_v36 = vadd.f32 %v277_v32, %v276_v31  ;;  %v284_v37 = vrot.slane %v283_v34, 4 }
  0x60   : > { %v279_v39 = vrot.slane %v278_v36, 2  ;;  %v285_v40 = vadd.f32 %v284_v37, %v283_v34 }
  0x62   : > { %v280_v42 = vadd.f32 %v279_v39, %v278_v36  ;;  %v286_v43 = vrot.slane %v285_v40, 2 }
  0x64   : > { %v281_v45 = vrot.slane %v280_v42, 1  ;;  %v287_v46 = vadd.f32 %v286_v43, %v285_v40 }
  0x66   : > { %v282_v48 = vadd.f32 %v281_v45, %v280_v42  ;;  %v288_v49 = vrot.slane %v287_v46, 1 }
  0x68   : > { %v289_v51 = vadd.f32 %v288_v49, %v287_v46  ;;  %517 = vlog2.f32 %v282_v48 }
  0x6a   : > { %519 = vlog2.f32 %v289_v51 }
  0x75   : > { %v518_v59 = vpop.eup %517 }
  0x76   : > { %v291_v60 = vmul.f32 0.6931472, %v518_v59 }
  0x77   : > { %v520_v62 = vpop.eup %519 }
  0x78   : > { %v293_v63 = vmul.f32 0.6931472, %v520_v62  ;;  %v323_v0 = vsub.f32 %v291_v60, %v315_v58 }
  0x7a   : > { %v324_v1 = vsub.f32 %v293_v63, %v322_v61 }
  0x7c   : > { %v325_v2 = vadd.f32 %v324_v1, %v323_v0 }
  0x7e   : > { %326 = vadd.xlane.f32.xlu0 %v325_v2 }
 0x107   : > { %v327_v4 = vpop.xlane.xlu0 %326 }
 0x108   : > { %v329_v5 = vadd.f32 %v328_v3, %v327_v4 }
 0x10a   : > { %331 = vst.msk [vmem:[%s763_s15] sm:$0x1] %vm242_vm0, %v329_v5 }
 0x10b PF: > { %s18_s14 = sadd.s32 1, %s631_s14   ;;  %s802_s9 = smov %s615_s10 }
 0x10c   : > { %p15_p7 = scmp.ge.s32.totalorder %s18_s14, 4   ;;  %s803_s10 = smov %s619_s11 }
 0x10d   : > { %s804_s11 = smov %s700_s21  ;;  %s805_s12 = smov %s627_s13 }
 0x10e   : > { %s806_s13 = smov %s808_s16  ;;  %17 = sbr.rel (!%p15_p7) target bundleno = 6 (0x6), region = 85 }
 0x113   :  { %352 = vsyncpa [#allocation3], 1 }
 0x114   :  { %354 = vsyncpa [#allocation3 + $0x1], 1 }
 0x115   :  { %355 = vsyncpa [#allocation5], 1 }
 0x116   :  { %357 = vsyncpa [#allocation5 + $0x1], 1 }

</bundles_post_ra>
